<compile_context>
chip_gen: v7x
topology: tpu7x:2x2x1
jax: 0.10.0
libtpu: 0.0.40
codegen_flags: <defaults>
</compile_context>

<pallas_src>
import jax
import jax.numpy as jnp
from jax.experimental import pallas as pl
from jax.experimental.pallas import tpu as pltpu

IN_FEATURES = 512
NUM_CLASS = 2      # RlNet: classifier(input_size=512, num_class=2)
BATCH = 8
TM_MAX = 512       # batch tile for large batches (f32 x tile = 1 MiB, 2 MiB double-buffered)


def classifier_kernel(x_ref, w_ref, b_ref, o_ref):
    # x_ref: [TM, 512] f32, w_ref: [512, C] bf16, b_ref: [1, C] f32, o_ref: [TM, C] f32
    x_bf16 = x_ref[...].astype(jnp.bfloat16)                                  # VPU cast, fused
    acc = jnp.dot(x_bf16, w_ref[...], preferred_element_type=jnp.float32)     # MXU, f32 acc
    acc = acc + b_ref[...]                                                    # VPU, f32
    # sigmoid(z) = 0.5 * tanh(z / 2) + 0.5  -> single exact EUP op.
    o_ref[...] = (0.5 * jnp.tanh(0.5 * acc) + 0.5).astype(o_ref.dtype)


def _round_up(n, m):
    return ((n + m - 1) // m) * m


def prepare_classifier_params(w, b):
    """One-time static parameter prep (hoisted out of the per-forward hot path)."""
    w_bf16 = w.astype(jnp.bfloat16)                       # [512, C] bf16 (MXU dtype)
    b_2d = jnp.reshape(b, (1, -1)).astype(jnp.float32)    # [1, C] f32 (f32 epilogue, v5e-safe)
    return w_bf16, b_2d


def classifier_forward(x, w_bf16, b_2d):
    """x: [B, 512] f32, w_bf16: [512, C] bf16, b_2d: [1, C] f32 -> [B, C] f32."""
    B, D = x.shape
    _, C = w_bf16.shape

    if B <= TM_MAX:
        TM = B           # full-array block: allowed even if B % 8 != 0 (block == array extent)
    else:
        TM = TM_MAX      # tiled; partial final block is masked by Pallas, no batch padding
    grid = pl.cdiv(B, TM)

    cost = pl.CostEstimate(
        flops=2 * B * D * C,
        transcendentals=B * C,                                   # one tanh per output element
        bytes_accessed=B * D * 4 + D * C * 2 + C * 4 + B * C * 4,
    )

    return pl.pallas_call(
        classifier_kernel,
        out_shape=jax.ShapeDtypeStruct((B, C), jnp.float32),
        grid_spec=pl.GridSpec(
            grid=(grid,),
            in_specs=[
                pl.BlockSpec((TM, D), lambda i: (i, 0)),   # x tile, streamed per step (f32)
                pl.BlockSpec((D, C), lambda i: (0, 0)),    # W, VMEM-resident, fetched once
                pl.BlockSpec((1, C), lambda i: (0, 0)),    # bias, VMEM-resident
            ],
            out_specs=pl.BlockSpec((TM, C), lambda i: (i, 0)),
        ),
        compiler_params=pltpu.CompilerParams(
            dimension_semantics=("parallel",),             # v7x megacore shards the batch axis
        ),
        cost_estimate=cost,
    )(x, w_bf16, b_2d)


if __name__ == "__main__":
    key = jax.random.PRNGKey(0)
    kx, kw, kb, kx2, kx3 = jax.random.split(key, 5)

    # Deterministic synthetic parameters (nn.Linear(512, 2) shapes).
    x = jax.random.normal(kx, (BATCH, IN_FEATURES), dtype=jnp.float32)
    w = jax.random.normal(kw, (IN_FEATURES, NUM_CLASS), dtype=jnp.float32) * 0.02
    b = jax.random.normal(kb, (NUM_CLASS,), dtype=jnp.float32) * 0.02

    # Static param prep done once (not per forward call).
    w_bf16, b_2d = prepare_classifier_params(w, b)

    out = classifier_forward(x, w_bf16, b_2d)
    jax.block_until_ready(out)
    assert out.shape == (BATCH, NUM_CLASS)

    # Reference (f32); looser tolerance because the matmul operands are bf16.
    ref = jax.nn.sigmoid(x @ w + b[None, :])
    assert jnp.allclose(out, ref, atol=1e-2, rtol=1e-2), "mismatch vs f32 reference"
    # Tighter check against a bf16-matmul reference.
    ref_bf16 = jax.nn.sigmoid(
        jnp.dot(x.astype(jnp.bfloat16), w.astype(jnp.bfloat16),
                preferred_element_type=jnp.float32) + b[None, :])
    assert jnp.allclose(out, ref_bf16, atol=2e-3, rtol=2e-3), "mismatch vs bf16 reference"

    # Batch not a multiple of 8 -> single full-array block, no padding materialized.
    x2 = jax.random.normal(kx2, (300, IN_FEATURES), dtype=jnp.float32)
    out2 = classifier_forward(x2, w_bf16, b_2d)
    jax.block_until_ready(out2)
    ref2 = jax.nn.sigmoid(x2 @ w + b[None, :])
    assert out2.shape == (300, NUM_CLASS)
    assert jnp.allclose(out2, ref2, atol=1e-2, rtol=1e-2), "mismatch on full-block path"

    # Large batch -> multi-step parallel grid (both v7x TensorCores) + partial last tile.
    x3 = jax.random.normal(kx3, (1100, IN_FEATURES), dtype=jnp.float32)
    out3 = classifier_forward(x3, w_bf16, b_2d)
    jax.block_until_ready(out3)
    ref3 = jax.nn.sigmoid(x3 @ w + b[None, :])
    assert out3.shape == (1100, NUM_CLASS)
    assert jnp.allclose(out3, ref3, atol=1e-2, rtol=1e-2), "mismatch on tiled path"

    print("KERNEL_OK")
</pallas_src>

<mosaic_0001>
module attributes {stable_mosaic.version = 11 : i64} {
  func.func @classifier_kernel(%arg0: i32, %arg1: memref<8x512xf32, #tpu.memory_space<vmem>>, %arg2: memref<512x2xbf16, #tpu.memory_space<vmem>>, %arg3: memref<1x2xf32, #tpu.memory_space<vmem>>, %arg4: memref<8x2xf32, #tpu.memory_space<vmem>>) attributes {dimension_semantics = [#tpu.dimension_semantics<parallel>], iteration_bounds = array<i64: 1>, scalar_prefetch = 0 : i64, scratch_operands = 0 : i64, tpu.core_type = #tpu.core_type<tc>, window_params = [{transform_indices = @transform_0, window_bounds = array<i64: 8, 512>}, {pipeline_mode = #tpu.pipeline_mode<synchronous>, transform_indices = @transform_1, window_bounds = array<i64: 512, 2>}, {pipeline_mode = #tpu.pipeline_mode<synchronous>, transform_indices = @transform_2, window_bounds = array<i64: 1, 2>}, {transform_indices = @transform_3, window_bounds = array<i64: 8, 2>}]} {
    %c0 = arith.constant 0 : index
    %c0_0 = arith.constant 0 : index
    %0 = vector.load %arg1[%c0, %c0_0] : memref<8x512xf32, #tpu.memory_space<vmem>>, vector<8x512xf32>
    %1 = arith.truncf %0 : vector<8x512xf32> to vector<8x512xbf16>
    %c0_1 = arith.constant 0 : index
    %c0_2 = arith.constant 0 : index
    %2 = vector.load %arg2[%c0_1, %c0_2] : memref<512x2xbf16, #tpu.memory_space<vmem>>, vector<512x2xbf16>
    %cst = arith.constant dense<0.000000e+00> : vector<8x2xf32>
    %3 = tpu.matmul %1, %2, %cst {dimension_numbers = #tpu.dot_dimension_numbers<[1], [0], [0], [1], [0, 0, 1, 1], [], []>} : vector<8x512xbf16>, vector<512x2xbf16>, vector<8x2xf32> -> vector<8x2xf32>
    %c0_3 = arith.constant 0 : index
    %c0_4 = arith.constant 0 : index
    %4 = vector.load %arg3[%c0_3, %c0_4] : memref<1x2xf32, #tpu.memory_space<vmem>>, vector<1x2xf32>
    %5 = vector.broadcast %4 : vector<1x2xf32> to vector<8x2xf32>
    %6 = arith.addf %3, %5 : vector<8x2xf32>
    %cst_5 = arith.constant 5.000000e-01 : f32
    %7 = vector.broadcast %cst_5 : f32 to vector<8x2xf32>
    %8 = arith.mulf %7, %6 : vector<8x2xf32>
    %9 = math.tanh %8 : vector<8x2xf32>
    %cst_6 = arith.constant 5.000000e-01 : f32
    %10 = vector.broadcast %cst_6 : f32 to vector<8x2xf32>
    %11 = arith.mulf %10, %9 : vector<8x2xf32>
    %cst_7 = arith.constant 5.000000e-01 : f32
    %12 = vector.broadcast %cst_7 : f32 to vector<8x2xf32>
    %13 = arith.addf %11, %12 : vector<8x2xf32>
    %c0_8 = arith.constant 0 : index
    %c0_9 = arith.constant 0 : index
    %14 = vector.load %arg4[%c0_8, %c0_9] : memref<8x2xf32, #tpu.memory_space<vmem>>, vector<8x2xf32>
    tpu.vector_store %arg4[%c0_8, %c0_9], %13 {strides = array<i32>} : memref<8x2xf32, #tpu.memory_space<vmem>>, vector<8x2xf32>,
    return
  }
  func.func @transform_0(%arg0: i32) -> (i32, i32) {
    %c0_i32 = arith.constant 0 : i32
    %c0_i32_0 = arith.constant 0 : i32
    return %arg0, %c0_i32 : i32, i32
  }
  func.func @transform_1(%arg0: i32) -> (i32, i32) {
    %c0_i32 = arith.constant 0 : i32
    %c0_i32_0 = arith.constant 0 : i32
    %c0_i32_1 = arith.constant 0 : i32
    return %c0_i32, %c0_i32_0 : i32, i32
  }
  func.func @transform_2(%arg0: i32) -> (i32, i32) {
    %c0_i32 = arith.constant 0 : i32
    %c0_i32_0 = arith.constant 0 : i32
    %c0_i32_1 = arith.constant 0 : i32
    return %c0_i32, %c0_i32_0 : i32, i32
  }
  func.func @transform_3(%arg0: i32) -> (i32, i32) {
    %c0_i32 = arith.constant 0 : i32
    %c0_i32_0 = arith.constant 0 : i32
    return %arg0, %c0_i32 : i32, i32
  }
}

</mosaic_0001>

<bundles_post_ra>
// kernel: tpu_custom_call.1
= control target key start
LH: loop header
LB: loop body
LE: loop exit
PB: predicated region body
PF: predicated region fallthrough
CT: control target
= control target key end

     0   :  { %vm370_vm0 = vcmask 15360   ;;  %s621_s1 = inlined_call_operand.vmem [shape: bf16[512,2], index: 1, kind: input, shape index: {}]   ;;  %s622_s0 = inlined_call_operand.vmem [shape: f32[8,512], index: 0, kind: input, shape index: {}]   ;;  %s623_s2 = inlined_call_operand.vmem [shape: f32[1,2], index: 2, kind: input, shape index: {}]   ;;  %s624_s3 = inlined_call_operand.vmem [shape: f32[8,2], index: 3, kind: output, shape index: {}]  }
   0x1   :  { %v453_v0 = vld [vmem:[%s621_s1 + $0x40] sm:$0xff]   ;;  %v457_v4 = vld [vmem:[%s621_s1 + $0x48] sm:$0xff]   ;;  %v461_v8 = vld [vmem:[%s621_s1 + $0x50] sm:$0xff]  }
   0x2   :  { %v454_v1 = vld [vmem:[%s621_s1 + $0xc0] sm:$0xff]   ;;  %409 = vmatprep.subr.bf16.mxu0 %v453_v0  ;;  %v458_v5 = vld [vmem:[%s621_s1 + $0xc8] sm:$0xff]   ;;  %v462_v9 = vld [vmem:[%s621_s1 + $0xd0] sm:$0xff]  }
   0x3   :  { %v455_v2 = vld [vmem:[%s621_s1] sm:$0xff]   ;;  %431 = vmatprep.subr.bf16.mxu1 %v454_v1  ;;  %v459_v6 = vld [vmem:[%s621_s1 + $0x8] sm:$0xff]   ;;  %v463_v10 = vld [vmem:[%s621_s1 + $0x10] sm:$0xff]  }
   0x4   :  { %v456_v3 = vld [vmem:[%s621_s1 + $0x80] sm:$0xff]   ;;  %410 = vmatpush3.bf16.msra.mxu0 %v455_v2  ;;  %v460_v7 = vld [vmem:[%s621_s1 + $0x88] sm:$0xff]   ;;  %v464_v11 = vld [vmem:[%s621_s1 + $0x90] sm:$0xff]  }
   0x5   :  { %432 = vmatpush3.bf16.msra.mxu1 %v456_v3  ;;  %411 = vmatprep.subr.bf16.mxu0 %v457_v4  ;;  %v465_v12 = vld [vmem:[%s621_s1 + $0x58] sm:$0xff]   ;;  %v469_v16 = vld [vmem:[%s621_s1 + $0x60] sm:$0xff]   ;;  %v473_v20 = vld [vmem:[%s621_s1 + $0x68] sm:$0xff]  }
   0x6   :  { %433 = vmatprep.subr.bf16.mxu1 %v458_v5  ;;  %v466_v13 = vld [vmem:[%s621_s1 + $0xd8] sm:$0xff]   ;;  %v470_v17 = vld [vmem:[%s621_s1 + $0xe0] sm:$0xff]   ;;  %v474_v21 = vld [vmem:[%s621_s1 + $0xe8] sm:$0xff]  }
   0x7   :  { %v467_v14 = vld [vmem:[%s621_s1 + $0x18] sm:$0xff]   ;;  %v471_v18 = vld [vmem:[%s621_s1 + $0x20] sm:$0xff]   ;;  %v475_v22 = vld [vmem:[%s621_s1 + $0x28] sm:$0xff]  }
   0x8   :  { %412 = vmatpush3.bf16.msra.mxu0 %v459_v6  ;;  %v468_v15 = vld [vmem:[%s621_s1 + $0x98] sm:$0xff]   ;;  %v472_v19 = vld [vmem:[%s621_s1 + $0xa0] sm:$0xff]   ;;  %v476_v23 = vld [vmem:[%s621_s1 + $0xa8] sm:$0xff]  }
   0x9   :  { %434 = vmatpush3.bf16.msra.mxu1 %v460_v7  ;;  %413 = vmatprep.subr.bf16.mxu0 %v461_v8  ;;  %v477_v24 = vld [vmem:[%s621_s1 + $0x70] sm:$0xff]   ;;  %v481_v28 = vld [vmem:[%s621_s1 + $0x78] sm:$0xff]   ;;  %v16_v32 = vld [vmem:[%s622_s0 + $0x8] sm:$0xff] }
   0xa   :  { %435 = vmatprep.subr.bf16.mxu1 %v462_v9  ;;  %v478_v25 = vld [vmem:[%s621_s1 + $0xf0] sm:$0xff]   ;;  %v482_v29 = vld [vmem:[%s621_s1 + $0xf8] sm:$0xff]   ;;  %v15_v34 = vld [vmem:[%s622_s0] sm:$0xff]  ;;  %v20_v35 = vpack.c.bf16 %v16_v32, %v16_v32 }
   0xb   :  { %v479_v26 = vld [vmem:[%s621_s1 + $0x30] sm:$0xff]   ;;  %v483_v30 = vld [vmem:[%s621_s1 + $0x38] sm:$0xff]   ;;  %v19_v37 = vpack.c.bf16 %v15_v34, %v15_v34  ;;  %v376_v42 = vld [vmem:[%s623_s2] ss:$0 sm:$0xff] }
   0xc   :  { %414 = vmatpush3.bf16.msra.mxu0 %v463_v10  ;;  %v480_v27 = vld [vmem:[%s621_s1 + $0xb0] sm:$0xff]   ;;  %v484_v31 = vld [vmem:[%s621_s1 + $0xb8] sm:$0xff]   ;;  %318 = vmatprep.mubr.bf16.mxu0 %v20_v35 }
   0xd   :  { %436 = vmatpush3.bf16.msra.mxu1 %v464_v11  ;;  %415 = vmatprep.subr.bf16.mxu0 %v465_v12  ;;  %v18_v33 = vld [vmem:[%s622_s0 + $0x18] sm:$0xff]  ;;  %v17_v38 = vld [vmem:[%s622_s0 + $0x10] sm:$0xff] }
   0xe   :  { %437 = vmatprep.subr.bf16.mxu1 %v466_v13  ;;  %v22_v36 = vpack.c.bf16 %v18_v33, %v18_v33  ;;  %v21_v39 = vpack.c.bf16 %v17_v38, %v17_v38 }
  0x10   :  { %416 = vmatpush3.bf16.msra.mxu0 %v467_v14  ;;  %358 = vmatprep.mubr.bf16.mxu1 %v22_v36 }
  0x11   :  { %438 = vmatpush3.bf16.msra.mxu1 %v468_v15  ;;  %417 = vmatprep.subr.bf16.mxu0 %v469_v16 }
  0x12   :  { %439 = vmatprep.subr.bf16.mxu1 %v470_v17 }
  0x14   :  { %418 = vmatpush3.bf16.msra.mxu0 %v471_v18 }
  0x15   :  { %440 = vmatpush3.bf16.msra.mxu1 %v472_v19  ;;  %419 = vmatprep.subr.bf16.mxu0 %v473_v20 }
  0x16   :  { %441 = vmatprep.subr.bf16.mxu1 %v474_v21 }
  0x18   :  { %420 = vmatpush3.bf16.msra.mxu0 %v475_v22 }
  0x19   :  { %442 = vmatpush3.bf16.msra.mxu1 %v476_v23  ;;  %421 = vmatprep.subr.bf16.mxu0 %v477_v24 }
  0x1a   :  { %443 = vmatprep.subr.bf16.mxu1 %v478_v25 }
  0x1c   :  { %422 = vmatpush3.bf16.msra.mxu0 %v479_v26 }
  0x1d   :  { %444 = vmatpush3.bf16.msra.mxu1 %v480_v27  ;;  %423 = vmatprep.subr.bf16.mxu0 %v481_v28 }
  0x1e   :  { %445 = vmatprep.subr.bf16.mxu1 %v482_v29 }
  0x20   :  { %424 = vmatpush3.bf16.msra.mxu0 %v483_v30 }
  0x21   :  { %446 = vmatpush3.bf16.msra.mxu1 %v484_v31 }
  0x23   :  { %319 = vmatmul.mubr.bf16.vlgmr.msra.gmra.mrb[0].mxu0 %v19_v37 }
  0x24   :  { %359 = vmatmul.mubr.bf16.vlgmr.msra.gmra.mrb[0].mxu1 %v21_v39 }
  0xf6   :  { %v425_v40 = vpop.f32.mrb[0].mxu0 }
  0xf7   :  { %v447_v41 = vpop.f32.mrb[0].mxu1  ;;  %v426_v43 = vpop.f32.mrb[1].mxu0 }
  0xf8   :  { %v448_v44 = vpop.f32.mrb[1].mxu1  ;;  %v427_v45 = vadd.f32 %v426_v43, %v425_v40  ;;  %v428_v47 = vpop.f32.mrb[2].mxu0 }
  0xf9   :  { %v449_v46 = vadd.f32 %v448_v44, %v447_v41  ;;  %v450_v48 = vpop.f32.mrb[2].mxu1  ;;  %v429_v49 = vpop.f32.mrb[3].mxu0 }
  0xfa   :  { %v451_v50 = vpop.f32.mrb[3].mxu1  ;;  %v321_v51 = vadd.f32 %v427_v45, %v376_v42 }
  0xfc   :  { %v361_v52 = vadd.f32 %v449_v46, %v321_v51 }
  0xfe   :  { %v366_v53 = vmul.f32 0.5, %v361_v52 }
 0x100   :  { %485 = vtanh.f32 %v366_v53 }
 0x10a   :  { %v486_v54 = vpop.eup %485 }
 0x10b   :  { %v368_v55 = vmul.f32 0.5, %v486_v54 }
 0x10d   :  { %v369_v56 = vadd.f32 0.5, %v368_v55 }
 0x10f   :  { %371 = vst.msk [vmem:[%s624_s3] sm:$0xff] %vm370_vm0, %v369_v56 }

</bundles_post_ra>
